<compile_context>
chip_gen: v5e
topology: v5e:2x2
jax: 0.10.0
libtpu: 0.0.40
codegen_flags: <defaults>
</compile_context>

<pallas_src>
import functools

import jax
import jax.numpy as jnp
import numpy as np
from jax.experimental import pallas as pl
from jax.experimental.pallas import tpu as pltpu


def _round_up(x, m):
    return ((x + m - 1) // m) * m


def _signet_kernel(path_ref, w1_ref, w2_ref, b_ref, out_ref, *, L, C):
    """One batch tile (TB rows) per grid step.

    path_ref: (TB, C, L+1)  augmented path with basepoint, channel-major
    w1_ref:   (C, O)        linear weight for level-1 terms (weight[:, :C].T)
    w2_ref:   (C, C, O)     linear weight for level-2 terms, [i, j, o]
    b_ref:    (1, O)        bias
    out_ref:  (TB, O)
    """
    p = path_ref[...]                       # (TB, C, L+1) f32
    prev = p[:, :, :L]                      # path[t],   t = 0 .. L-1
    curr = p[:, :, 1:]                      # path[t+1]
    dx = curr - prev                        # (TB, C, L)  path increments
    q = 0.5 * (curr + prev)                 # segment midpoints

    # Level-1 signature: S1 = sum_t dx_t                        -> (TB, C)
    s1 = jnp.sum(dx, axis=-1)
    # Level-2 signature: S2[b,i,j] = sum_t q[b,i,t] * dx[b,j,t]  -> (TB, C, C)
    s2 = jnp.einsum('bil,bjl->bij', q, dx, preferred_element_type=jnp.float32)

    # Fused linear, all matmuls with M = TB.
    acc = jnp.dot(s1, w1_ref[...], preferred_element_type=jnp.float32)   # (TB, O)
    for i in range(C):
        acc = acc + jnp.dot(s2[:, i, :], w2_ref[i],
                            preferred_element_type=jnp.float32)
    out_ref[...] = (acc + b_ref[...]).astype(out_ref.dtype)


def signet_forward(inp, weight, bias, *, sig_depth=2, include_time=True,
                   use_linear=True, batch_block=256):
    """Forward pass of SigNet. inp: (B, L, C_in)."""
    assert sig_depth == 2, "Pallas kernel implements sig_depth == 2 only"
    assert use_linear, "this kernel fuses the linear layer"
    B, L, Cin = inp.shape
    if L <= 1:
        raise RuntimeError(
            "Given an input with too short a stream to take the signature")

    C = Cin + (1 if include_time else 0)
    out_dim = weight.shape[0]
    assert weight.shape == (out_dim, C + C * C)

    # ---- glue (plain JAX): augmentation + basepoint, channel-major layout ----
    x = inp.astype(jnp.float32)
    xt = jnp.transpose(x, (0, 2, 1))                                      # (B, Cin, L)
    chans = [xt]
    if include_time:
        time = jnp.linspace(0.0, 1.0, L, dtype=jnp.float32)
        chans.append(jnp.broadcast_to(time[None, None, :], (B, 1, L)))
    x_aug = jnp.concatenate(chans, axis=1)                                # (B, C, L)
    path_t = jnp.concatenate(                                             # basepoint 0
        [jnp.zeros((B, C, 1), jnp.float32), x_aug], axis=2)               # (B, C, L+1)

    # batch blocking (TB multiple of 8; pad batch so it divides evenly)
    TB = min(batch_block, _round_up(B, 8))
    TB = _round_up(TB, 8)
    B_pad = _round_up(B, TB)
    if B_pad != B:
        path_t = jnp.pad(path_t, ((0, B_pad - B), (0, 0), (0, 0)))

    # Split / reshape the Linear weight.  y = [s1 (C), s2.reshape(C*C)], so the
    # columns of `weight` for s2[i, j] sit at index C + i*C + j.
    wt = weight.astype(jnp.float32)
    W1 = wt[:, :C].T                                                      # (C, O)
    W2 = wt[:, C:].T.reshape(C, C, out_dim)                               # (C, C, O)
    b2d = bias.astype(jnp.float32).reshape(1, out_dim)

    Lp = L + 1
    kernel = functools.partial(_signet_kernel, L=L, C=C)

    out = pl.pallas_call(
        kernel,
        out_shape=jax.ShapeDtypeStruct((B_pad, out_dim), jnp.float32),
        grid_spec=pltpu.PrefetchScalarGridSpec(
            num_scalar_prefetch=0,
            grid=(B_pad // TB,),
            in_specs=[
                pl.BlockSpec((TB, C, Lp), lambda b: (b, 0, 0)),        # streamed path
                pl.BlockSpec((C, out_dim), lambda b: (0, 0)),          # resident W1
                pl.BlockSpec((C, C, out_dim), lambda b: (0, 0, 0)),    # resident W2
                pl.BlockSpec((1, out_dim), lambda b: (0, 0)),          # resident bias
            ],
            out_specs=pl.BlockSpec((TB, out_dim), lambda b: (b, 0)),
        ),
        compiler_params=pltpu.CompilerParams(
            dimension_semantics=("parallel",)),
    )(path_t, W1, W2, b2d)

    return out[:B].astype(inp.dtype)


def signet_reference(inp, weight, bias, *, include_time=True):
    """Pure-JAX reference (Chen recursion, no Pallas) for verification."""
    B, L, Cin = inp.shape
    C = Cin + (1 if include_time else 0)
    pieces = [inp]
    if include_time:
        time = jnp.linspace(0.0, 1.0, L, dtype=inp.dtype)
        pieces.append(
            jnp.broadcast_to(time[None, :, None], (B, L, 1)).astype(inp.dtype))
    x_aug = jnp.concatenate(pieces, axis=2)
    path = jnp.concatenate([jnp.zeros((B, 1, C), inp.dtype), x_aug], axis=1)
    dx = path[:, 1:] - path[:, :-1]
    s1 = jnp.zeros((B, C), jnp.float32)
    s2 = jnp.zeros((B, C, C), jnp.float32)
    for t in range(L):
        v = dx[:, t].astype(jnp.float32)
        s2 = s2 + s1[:, :, None] * v[:, None, :] + 0.5 * v[:, :, None] * v[:, None, :]
        s1 = s1 + v
    y = jnp.concatenate([s1, s2.reshape(B, C * C)], axis=-1)
    return y @ weight.T + bias


if __name__ == "__main__":
    # SigNet(in_channels=4, out_dimension=16, sig_depth=2, include_time=True,
    # use_linear=True) on a small deterministic input.
    B, L, Cin = 2, 8, 4
    sig_depth = 2
    include_time = True
    C = Cin + 1
    sig_channels = C + C * C        # signatory.signature_channels(5, depth=2) = 30
    out_dim = 16

    key = jax.random.PRNGKey(0)
    k_inp, k_w, k_b = jax.random.split(key, 3)
    inp = jax.random.normal(k_inp, (B, L, Cin), dtype=jnp.float32)
    weight = 0.1 * jax.random.normal(k_w, (out_dim, sig_channels), dtype=jnp.float32)
    bias = 0.1 * jax.random.normal(k_b, (out_dim,), dtype=jnp.float32)

    fwd = jax.jit(functools.partial(signet_forward, sig_depth=sig_depth,
                                    include_time=include_time, use_linear=True))
    z = fwd(inp, weight, bias)
    jax.block_until_ready(z)

    z_ref = signet_reference(inp, weight, bias, include_time=include_time)
    np.testing.assert_allclose(np.asarray(z), np.asarray(z_ref),
                               rtol=1e-4, atol=1e-4)
    print("KERNEL_OK")
</pallas_src>

<mosaic_0001>
module attributes {stable_mosaic.version = 11 : i64} {
  func.func @_signet_kernel(%arg0: i32, %arg1: memref<8x5x9xf32, #tpu.memory_space<vmem>>, %arg2: memref<5x16xf32, #tpu.memory_space<vmem>>, %arg3: memref<5x5x16xf32, #tpu.memory_space<vmem>>, %arg4: memref<1x16xf32, #tpu.memory_space<vmem>>, %arg5: memref<8x16xf32, #tpu.memory_space<vmem>>) attributes {dimension_semantics = [#tpu.dimension_semantics<parallel>], iteration_bounds = array<i64: 1>, scalar_prefetch = 0 : i64, scratch_operands = 0 : i64, tpu.core_type = #tpu.core_type<tc>, window_params = [{transform_indices = @transform_0, window_bounds = array<i64: 8, 5, 9>}, {pipeline_mode = #tpu.pipeline_mode<synchronous>, transform_indices = @transform_1, window_bounds = array<i64: 5, 16>}, {pipeline_mode = #tpu.pipeline_mode<synchronous>, transform_indices = @transform_2, window_bounds = array<i64: 5, 5, 16>}, {pipeline_mode = #tpu.pipeline_mode<synchronous>, transform_indices = @transform_3, window_bounds = array<i64: 1, 16>}, {transform_indices = @transform_4, window_bounds = array<i64: 8, 16>}]} {
    %c0 = arith.constant 0 : index
    %c0_0 = arith.constant 0 : index
    %c0_1 = arith.constant 0 : index
    %0 = vector.load %arg1[%c0, %c0_0, %c0_1] : memref<8x5x9xf32, #tpu.memory_space<vmem>>, vector<8x5x9xf32>
    %1 = vector.extract_strided_slice %0 {offsets = [0, 0, 0], sizes = [8, 5, 8], strides = [1, 1, 1]} : vector<8x5x9xf32> to vector<8x5x8xf32>
    %2 = vector.extract_strided_slice %0 {offsets = [0, 0, 1], sizes = [8, 5, 8], strides = [1, 1, 1]} : vector<8x5x9xf32> to vector<8x5x8xf32>
    %3 = arith.subf %2, %1 : vector<8x5x8xf32>
    %4 = arith.addf %2, %1 : vector<8x5x8xf32>
    %cst = arith.constant 5.000000e-01 : f32
    %5 = vector.broadcast %cst : f32 to vector<8x5x8xf32>
    %6 = arith.mulf %5, %4 : vector<8x5x8xf32>
    %cst_2 = arith.constant dense<0.000000e+00> : vector<8x5xf32>
    %7 = vector.multi_reduction <add>, %3, %cst_2 [2] : vector<8x5x8xf32> to vector<8x5xf32>
    "tpu.trace_start"() <{level = 10 : i32, message = "bil,bjl->bij"}> : () -> ()
    %cst_3 = arith.constant dense<0.000000e+00> : vector<8x5x5xf32>
    %8 = tpu.matmul %6, %3, %cst_3 {dimension_numbers = #tpu.dot_dimension_numbers<[2], [2], [1], [1], [0, 0, 0, 1, 1, 1], [0], [0]>} : vector<8x5x8xf32>, vector<8x5x8xf32>, vector<8x5x5xf32> -> vector<8x5x5xf32>
    "tpu.trace_stop"() : () -> ()
    %c0_4 = arith.constant 0 : index
    %c0_5 = arith.constant 0 : index
    %9 = vector.load %arg2[%c0_4, %c0_5] : memref<5x16xf32, #tpu.memory_space<vmem>>, vector<5x16xf32>
    %cst_6 = arith.constant dense<0.000000e+00> : vector<8x16xf32>
    %10 = tpu.matmul %7, %9, %cst_6 {dimension_numbers = #tpu.dot_dimension_numbers<[1], [0], [0], [1], [0, 0, 1, 1], [], []>} : vector<8x5xf32>, vector<5x16xf32>, vector<8x16xf32> -> vector<8x16xf32>
    %11 = vector.extract_strided_slice %8 {offsets = [0, 0, 0], sizes = [8, 1, 5], strides = [1, 1, 1]} : vector<8x5x5xf32> to vector<8x1x5xf32>
    %12 = vector.shape_cast %11 : vector<8x1x5xf32> to vector<8x5xf32>
    %c0_7 = arith.constant 0 : index
    %c0_8 = arith.constant 0 : index
    %c0_9 = arith.constant 0 : index
    %13 = vector.load %arg3[%c0_7, %c0_8, %c0_9] : memref<5x5x16xf32, #tpu.memory_space<vmem>>, vector<1x5x16xf32>
    %14 = vector.shape_cast %13 : vector<1x5x16xf32> to vector<5x16xf32>
    %cst_10 = arith.constant dense<0.000000e+00> : vector<8x16xf32>
    %15 = tpu.matmul %12, %14, %cst_10 {dimension_numbers = #tpu.dot_dimension_numbers<[1], [0], [0], [1], [0, 0, 1, 1], [], []>} : vector<8x5xf32>, vector<5x16xf32>, vector<8x16xf32> -> vector<8x16xf32>
    %16 = arith.addf %10, %15 : vector<8x16xf32>
    %17 = vector.extract_strided_slice %8 {offsets = [0, 1, 0], sizes = [8, 1, 5], strides = [1, 1, 1]} : vector<8x5x5xf32> to vector<8x1x5xf32>
    %18 = vector.shape_cast %17 : vector<8x1x5xf32> to vector<8x5xf32>
    %c1 = arith.constant 1 : index
    %c0_11 = arith.constant 0 : index
    %c0_12 = arith.constant 0 : index
    %19 = vector.load %arg3[%c1, %c0_11, %c0_12] : memref<5x5x16xf32, #tpu.memory_space<vmem>>, vector<1x5x16xf32>
    %20 = vector.shape_cast %19 : vector<1x5x16xf32> to vector<5x16xf32>
    %cst_13 = arith.constant dense<0.000000e+00> : vector<8x16xf32>
    %21 = tpu.matmul %18, %20, %cst_13 {dimension_numbers = #tpu.dot_dimension_numbers<[1], [0], [0], [1], [0, 0, 1, 1], [], []>} : vector<8x5xf32>, vector<5x16xf32>, vector<8x16xf32> -> vector<8x16xf32>
    %22 = arith.addf %16, %21 : vector<8x16xf32>
    %23 = vector.extract_strided_slice %8 {offsets = [0, 2, 0], sizes = [8, 1, 5], strides = [1, 1, 1]} : vector<8x5x5xf32> to vector<8x1x5xf32>
    %24 = vector.shape_cast %23 : vector<8x1x5xf32> to vector<8x5xf32>
    %c2 = arith.constant 2 : index
    %c0_14 = arith.constant 0 : index
    %c0_15 = arith.constant 0 : index
    %25 = vector.load %arg3[%c2, %c0_14, %c0_15] : memref<5x5x16xf32, #tpu.memory_space<vmem>>, vector<1x5x16xf32>
    %26 = vector.shape_cast %25 : vector<1x5x16xf32> to vector<5x16xf32>
    %cst_16 = arith.constant dense<0.000000e+00> : vector<8x16xf32>
    %27 = tpu.matmul %24, %26, %cst_16 {dimension_numbers = #tpu.dot_dimension_numbers<[1], [0], [0], [1], [0, 0, 1, 1], [], []>} : vector<8x5xf32>, vector<5x16xf32>, vector<8x16xf32> -> vector<8x16xf32>
    %28 = arith.addf %22, %27 : vector<8x16xf32>
    %29 = vector.extract_strided_slice %8 {offsets = [0, 3, 0], sizes = [8, 1, 5], strides = [1, 1, 1]} : vector<8x5x5xf32> to vector<8x1x5xf32>
    %30 = vector.shape_cast %29 : vector<8x1x5xf32> to vector<8x5xf32>
    %c3 = arith.constant 3 : index
    %c0_17 = arith.constant 0 : index
    %c0_18 = arith.constant 0 : index
    %31 = vector.load %arg3[%c3, %c0_17, %c0_18] : memref<5x5x16xf32, #tpu.memory_space<vmem>>, vector<1x5x16xf32>
    %32 = vector.shape_cast %31 : vector<1x5x16xf32> to vector<5x16xf32>
    %cst_19 = arith.constant dense<0.000000e+00> : vector<8x16xf32>
    %33 = tpu.matmul %30, %32, %cst_19 {dimension_numbers = #tpu.dot_dimension_numbers<[1], [0], [0], [1], [0, 0, 1, 1], [], []>} : vector<8x5xf32>, vector<5x16xf32>, vector<8x16xf32> -> vector<8x16xf32>
    %34 = arith.addf %28, %33 : vector<8x16xf32>
    %35 = vector.extract_strided_slice %8 {offsets = [0, 4, 0], sizes = [8, 1, 5], strides = [1, 1, 1]} : vector<8x5x5xf32> to vector<8x1x5xf32>
    %36 = vector.shape_cast %35 : vector<8x1x5xf32> to vector<8x5xf32>
    %c4 = arith.constant 4 : index
    %c0_20 = arith.constant 0 : index
    %c0_21 = arith.constant 0 : index
    %37 = vector.load %arg3[%c4, %c0_20, %c0_21] : memref<5x5x16xf32, #tpu.memory_space<vmem>>, vector<1x5x16xf32>
    %38 = vector.shape_cast %37 : vector<1x5x16xf32> to vector<5x16xf32>
    %cst_22 = arith.constant dense<0.000000e+00> : vector<8x16xf32>
    %39 = tpu.matmul %36, %38, %cst_22 {dimension_numbers = #tpu.dot_dimension_numbers<[1], [0], [0], [1], [0, 0, 1, 1], [], []>} : vector<8x5xf32>, vector<5x16xf32>, vector<8x16xf32> -> vector<8x16xf32>
    %40 = arith.addf %34, %39 : vector<8x16xf32>
    %c0_23 = arith.constant 0 : index
    %c0_24 = arith.constant 0 : index
    %41 = vector.load %arg4[%c0_23, %c0_24] : memref<1x16xf32, #tpu.memory_space<vmem>>, vector<1x16xf32>
    %42 = vector.broadcast %41 : vector<1x16xf32> to vector<8x16xf32>
    %43 = arith.addf %40, %42 : vector<8x16xf32>
    %c0_25 = arith.constant 0 : index
    %c0_26 = arith.constant 0 : index
    %44 = vector.load %arg5[%c0_25, %c0_26] : memref<8x16xf32, #tpu.memory_space<vmem>>, vector<8x16xf32>
    tpu.vector_store %arg5[%c0_25, %c0_26], %43 {strides = array<i32>} : memref<8x16xf32, #tpu.memory_space<vmem>>, vector<8x16xf32>,
    return
  }
  func.func @transform_0(%arg0: i32) -> (i32, i32, i32) {
    %c0_i32 = arith.constant 0 : i32
    %c0_i32_0 = arith.constant 0 : i32
    %c0_i32_1 = arith.constant 0 : i32
    return %arg0, %c0_i32, %c0_i32_0 : i32, i32, i32
  }
  func.func @transform_1(%arg0: i32) -> (i32, i32) {
    %c0_i32 = arith.constant 0 : i32
    %c0_i32_0 = arith.constant 0 : i32
    %c0_i32_1 = arith.constant 0 : i32
    return %c0_i32, %c0_i32_0 : i32, i32
  }
  func.func @transform_2(%arg0: i32) -> (i32, i32, i32) {
    %c0_i32 = arith.constant 0 : i32
    %c0_i32_0 = arith.constant 0 : i32
    %c0_i32_1 = arith.constant 0 : i32
    %c0_i32_2 = arith.constant 0 : i32
    return %c0_i32, %c0_i32_0, %c0_i32_1 : i32, i32, i32
  }
  func.func @transform_3(%arg0: i32) -> (i32, i32) {
    %c0_i32 = arith.constant 0 : i32
    %c0_i32_0 = arith.constant 0 : i32
    %c0_i32_1 = arith.constant 0 : i32
    return %c0_i32, %c0_i32_0 : i32, i32
  }
  func.func @transform_4(%arg0: i32) -> (i32, i32) {
    %c0_i32 = arith.constant 0 : i32
    %c0_i32_0 = arith.constant 0 : i32
    return %arg0, %c0_i32 : i32, i32
  }
}

</mosaic_0001>

<bundles_post_ra>
// kernel: signet_forward.1
= control target key start
LH: loop header
LB: loop body
LE: loop exit
PB: predicated region body
PF: predicated region fallthrough
CT: control target
= control target key end

     0   :  { %s677_s19 = smov 1   ;;  %s678_s6 = smov 127   ;;  %vm141_vm0 = vcmask 64512   ;;  %vm113_vm1 = vcmask 61440   ;;  %vm389_vm2 = vcmask 1044480   ;;  %vm366_vm3 = vcmask 1041409   ;;  %s853_s0 = inlined_call_operand.vmem [shape: f32[8,5,9], index: 0, kind: input, shape index: {}]   ;;  %s854_s1 = inlined_call_operand.vmem [shape: f32[5,16], index: 1, kind: input, shape index: {}]   ;;  %s855_s2 = inlined_call_operand.vmem [shape: f32[5,5,16], index: 2, kind: input, shape index: {}]   ;;  %s856_s3 = inlined_call_operand.vmem [shape: f32[1,16], index: 3, kind: input, shape index: {}]   ;;  %s857_s4 = inlined_call_operand.vmem [shape: f32[8,16], index: 4, kind: output, shape index: {}]  }
   0x1   :  { %v19_v0 = vld [vmem:[%s853_s0 + $0x10] sm:$0x1f]  ;;  %v17_v1 = vld [vmem:[%s853_s0] sm:$0x1f]  ;;  %v20_v3 = vld [vmem:[%s853_s0 + $0x18] sm:$0x1f] }
   0x2   :  { %37 = vrot.lane.b32.xlu0 %v19_v0, %s677_s19  ;;  %33 = vrot.lane.b32.xlu1 %v17_v1, %s677_s19  ;;  %v23_v2 = vld [vmem:[%s853_s0 + $0x30] sm:$0x1f]  ;;  %v18_v4 = vld [vmem:[%s853_s0 + $0x8] sm:$0x1f]  ;;  %vm369_vm4 = vcmask 1042434   ;;  %vm372_vm5 = vcmask 1043459  }
   0x3   :  { %45 = vrot.lane.b32.xlu2 %v23_v2, %s677_s19  ;;  %v24_v5 = vld [vmem:[%s853_s0 + $0x38] sm:$0x1f]  ;;  %v21_v6 = vld [vmem:[%s853_s0 + $0x20] sm:$0x1f]  ;;  %v22_v7 = vld [vmem:[%s853_s0 + $0x28] sm:$0x1f] }
   0x4   :  { %vm375_vm6 = vcmask 1044484   ;;  %vm378_vm7 = vcmask 1045509   ;;  %vm381_vm8 = vcmask 1046534   ;;  %vm384_vm9 = vcmask 1047559  }
   0x5   :  { %vm386_vm10 = vcmask 39936   ;;  %vm636_vm11 = vcmask 130048  }
   0xa   :  { %39 = vrot.lane.b32.xlu0 %v20_v3, %s677_s19  ;;  %35 = vrot.lane.b32.xlu1 %v18_v4, %s677_s19 }
   0xb   :  { %47 = vrot.lane.b32.xlu2 %v24_v5, %s677_s19 }
  0x12   :  { %41 = vrot.lane.b32.xlu0 %v21_v6, %s677_s19  ;;  %43 = vrot.lane.b32.xlu1 %v22_v7, %s677_s19 }
  0x5d   :  { %v46_v11 = vpop.permute.xlu2 %45 }
  0x5e   :  { %v63_v18 = vsub.f32 %v23_v2, %v46_v11  ;;  %v71_v29 = vadd.f32 %v46_v11, %v23_v2 }
  0x60   :  { %v79_v33 = vmul.f32 0.5, %v71_v29 }
  0x65   :  { %v48_v17 = vpop.permute.xlu2 %47 }
  0x66   :  { %v64_v19 = vsub.f32 %v24_v5, %v48_v17  ;;  %v72_v28 = vadd.f32 %v48_v17, %v24_v5  ;;  %v665_v5 = vld [vmem:[%s855_s2 + $0x10] sm:$0x1f] }
  0x68   :  { %v80_v31 = vmul.f32 0.5, %v72_v28 }
  0x74   :  { %v38_v8 = vpop.permute.xlu0 %37  ;;  %v34_v9 = vpop.permute.xlu1 %33 }
  0x75   :  { %v59_v10 = vsub.f32 %v19_v0, %v38_v8  ;;  %v57_v14 = vsub.f32 %v17_v1, %v34_v9  ;;  %v65_v22 = vadd.f32 %v34_v9, %v17_v1  ;;  %v67_v24 = vadd.f32 %v38_v8, %v19_v0  ;;  %v355_v0 = vld [vmem:[%s854_s1] sm:$0x1f]  ;;  %v668_v9 = vld [vmem:[%s855_s2 + $0x18] sm:$0x1f] }
  0x77   :  { %93 = vrot.lane.b32.xlu2 %v59_v10, %s678_s6  ;;  %v73_v25 = vmul.f32 0.5, %v65_v22  ;;  %v75_v27 = vmul.f32 0.5, %v67_v24 }
  0x7c   :  { %v40_v12 = vpop.permute.xlu0 %39  ;;  %v36_v13 = vpop.permute.xlu1 %35 }
  0x7d   :  { %v60_v15 = vsub.f32 %v20_v3, %v40_v12  ;;  %v58_v16 = vsub.f32 %v18_v4, %v36_v13  ;;  %v68_v23 = vadd.f32 %v40_v12, %v20_v3  ;;  %v66_v30 = vadd.f32 %v36_v13, %v18_v4  ;;  %v662_v3 = vld [vmem:[%s855_s2 + $0x8] sm:$0x1f]  ;;  %v356_v4 = vld [vmem:[%s855_s2] sm:$0x1f] }
  0x7f   :  { %95 = vrot.lane.b32.xlu0 %v60_v15, %s678_s6  ;;  %89 = vrot.lane.b32.xlu2 %v57_v14, %s678_s6  ;;  %v76_v26 = vmul.f32 0.5, %v68_v23  ;;  %v74_v34 = vmul.f32 0.5, %v66_v30 }
  0x80   :  { %91 = vrot.lane.b32.xlu1 %v58_v16, %s678_s6 }
  0x84   :  { %v42_v20 = vpop.permute.xlu0 %41  ;;  %v44_v32 = vpop.permute.xlu1 %43 }
  0x85   :  { %v61_v21 = vsub.f32 %v21_v6, %v42_v20  ;;  %v70_v35 = vadd.f32 %v44_v32, %v22_v7  ;;  %v69_v36 = vadd.f32 %v42_v20, %v21_v6  ;;  %v62_v37 = vsub.f32 %v22_v7, %v44_v32  ;;  %v671_v6 = vld [vmem:[%s855_s2 + $0x20] sm:$0x1f] }
  0x86   :  { %v421_v7 = vlaneseq }
  0x87   :  { %101 = vrot.lane.b32.xlu0 %v63_v18, %s678_s6  ;;  %103 = vrot.lane.b32.xlu2 %v64_v19, %s678_s6  ;;  %v78_v38 = vmul.f32 0.5, %v70_v35  ;;  %v77_v39 = vmul.f32 0.5, %v69_v36 }
  0x88   :  { %97 = vrot.lane.b32.xlu1 %v61_v21, %s678_s6  ;;  %v422_v10 = vand.u32 127, %v421_v7 }
  0x8f   :  { %221 = vrot.lane.b32.xlu0 %v76_v26, %s678_s6  ;;  %139 = vrot.lane.b32.xlu2 %v73_v25, %s678_s6 }
  0x90   :  { %194 = vrot.lane.b32.xlu1 %v75_v27, %s678_s6 }
  0x97   :  { %302 = vrot.lane.b32.xlu0 %v79_v33, %s678_s6  ;;  %329 = vrot.lane.b32.xlu2 %v80_v31, %s678_s6 }
  0x98   :  { %167 = vrot.lane.b32.xlu1 %v74_v34, %s678_s6 }
  0x9f   :  { %99 = vrot.lane.b32.xlu0 %v62_v37, %s678_s6  ;;  %275 = vrot.lane.b32.xlu2 %v78_v38, %s678_s6 }
  0xa0   :  { %248 = vrot.lane.b32.xlu1 %v77_v39, %s678_s6 }
  0xd1   :  { %v94_v40 = vpop.permute.xlu2 %93 }
  0xd2   :  { %646 = vmatpush.xpose.msk.msra.mxu2 %vm141_vm0, %v94_v40  ;;  %v120_v41 = vsel %vm113_vm1, %v94_v40, 0.0 }
  0xd3   :  { %121 = vadd.xlane.f32.xlu2 %v120_v41 }
  0xd9   :  { %v90_v42 = vpop.permute.xlu2 %89 }
  0xda   :  { %642 = vmatpush.xpose.msk.msra.mxu0 %vm141_vm0, %v90_v42  ;;  %v114_v43 = vsel %vm113_vm1, %v90_v42, 0.0 }
  0xdb   :  { %115 = vadd.xlane.f32.xlu0 %v114_v43 }
  0xe1   :  { %v104_v44 = vpop.permute.xlu2 %103 }
  0xe2   :  { %v135_v56 = vsel %vm113_vm1, %v104_v44, 0.0 }
  0xe9   :  { %v140_v45 = vpop.permute.xlu2 %139 }
  0xea   :  { %643 = vmatmul.msk.f32.vlgmr.msra.gmra.mxu0 %vm141_vm0, %v140_v45 }
  0xf1   :  { %v96_v46 = vpop.permute.xlu0 %95  ;;  %v330_v57 = vpop.permute.xlu2 %329 }
  0xf2   :  { %v92_v47 = vpop.permute.xlu1 %91  ;;  %648 = vmatpush.xpose.msk.msra.mxu3 %vm141_vm0, %v96_v46  ;;  %v123_v48 = vsel %vm113_vm1, %v96_v46, 0.0 }
  0xf3   :  { %124 = vadd.xlane.f32.xlu2 %v123_v48  ;;  %v117_v49 = vsel %vm113_vm1, %v92_v47, 0.0  ;;  %644 = vmatpush.xpose.msk.msra.mxu1 %vm141_vm0, %v92_v47 }
  0xf4   :  { %118 = vadd.xlane.f32.xlu1 %v117_v49 }
  0xf6   :  { %656 = vmatpush.xpose.msk.msrb.mxu3 %vm141_vm0, %v104_v44 }
  0xf9   :  { %v102_v50 = vpop.permute.xlu0 %101  ;;  %v276_v63 = vpop.permute.xlu2 %275 }
  0xfa   :  { %v98_v51 = vpop.permute.xlu1 %97  ;;  %654 = vmatpush.xpose.msk.msrb.mxu2 %vm141_vm0, %v102_v50  ;;  %v132_v52 = vsel %vm113_vm1, %v102_v50, 0.0 }
  0xfb   :  { %133 = vadd.xlane.f32.xlu2 %v132_v52  ;;  %v126_v53 = vsel %vm113_vm1, %v98_v51, 0.0  ;;  %650 = vmatpush.xpose.msk.msrb.mxu0 %vm141_vm0, %v98_v51 }
  0xfc   :  { %127 = vadd.xlane.f32.xlu0 %v126_v53 }
  0xff   :  { %658 = vmatpush.msk.msra.mxu0 %vm389_vm2, %v356_v4 }
 0x101   :  { %v222_v54 = vpop.permute.xlu0 %221 }
 0x102   :  { %v195_v55 = vpop.permute.xlu1 %194  ;;  %649 = vmatmul.msk.f32.vlgmr.msra.gmra.mxu3 %vm141_vm0, %v222_v54 }
 0x103   :  { %647 = vmatmul.msk.f32.vlgmr.msra.gmra.mxu2 %vm141_vm0, %v195_v55  ;;  %666 = vmatpush.msk.msra.mxu3 %vm389_vm2, %v665_v5 }
 0x104   :  { %136 = vadd.xlane.f32.xlu0 %v135_v56  ;;  %663 = vmatpush.msk.msra.mxu2 %vm389_vm2, %v662_v3 }
 0x109   :  { %v303_v58 = vpop.permute.xlu0 %302 }
 0x10a   :  { %v168_v59 = vpop.permute.xlu1 %167  ;;  %657 = vmatmul.msk.f32.vlgmr.msrb.gmra.mxu3 %vm141_vm0, %v330_v57 }
 0x10b   :  { %645 = vmatmul.msk.f32.vlgmr.msra.gmra.mxu1 %vm141_vm0, %v168_v59  ;;  %655 = vmatmul.msk.f32.vlgmr.msrb.gmra.mxu2 %vm141_vm0, %v303_v58 }
 0x111   :  { %v100_v60 = vpop.permute.xlu0 %99 }
 0x112   :  { %v249_v61 = vpop.permute.xlu1 %248  ;;  %652 = vmatpush.xpose.msk.msrb.mxu1 %vm141_vm0, %v100_v60  ;;  %v129_v62 = vsel %vm113_vm1, %v100_v60, 0.0 }
 0x113   :  { %651 = vmatmul.msk.f32.vlgmr.msrb.gmra.mxu0 %vm141_vm0, %v249_v61  ;;  %130 = vadd.xlane.f32.xlu1 %v129_v62 }
 0x114   :  { %669 = vmatpush.msk.msrb.mxu0 %vm389_vm2, %v668_v9 }
 0x115   :  { %653 = vmatmul.msk.f32.vlgmr.msrb.gmra.mxu1 %vm141_vm0, %v276_v63 }
 0x116   :  { %660 = vmatpush.msk.msra.mxu1 %vm389_vm2, %v355_v0 }
 0x118   :  { %672 = vmatpush.msk.msrb.mxu1 %vm389_vm2, %v671_v6 }
 0x146   :  { %v122_v1 = vpop.xlane.xlu2 %121 }
 0x147   :  { %v425_v16 = vperm.slane %v122_v1, %v422_v10 }
 0x14e   :  { %v116_v2 = vpop.xlane.xlu0 %115 }
 0x14f   :  { %v423_v14 = vperm.slane %v116_v2, %v422_v10 }
 0x166   :  { %v125_v11 = vpop.xlane.xlu2 %124 }
 0x167   :  { %v119_v8 = vpop.xlane.xlu1 %118  ;;  %v163_v17 = vpop.f32.mrf.mxu0  ;;  %v426_v19 = vperm.slane %v125_v11, %v422_v10 }
 0x168   :  { %v424_v13 = vperm.slane %v119_v8, %v422_v10  ;;  %v465_v22 = vrot.slane %v163_v17, 1  ;;  %v507_v25 = vrot.slane %v163_v17, 2  ;;  %v549_v26 = vrot.slane %v163_v17, 3 }
 0x169   :  { %v591_v27 = vrot.slane %v163_v17, 4 }
 0x16a   :  { %v431_v15 = vsel %vm366_vm3, %v424_v13, %v423_v14 }
 0x16b   :  { %v432_v18 = vsel %vm369_vm4, %v425_v16, %v431_v15 }
 0x16c   :  { %v433_v28 = vsel %vm372_vm5, %v426_v19, %v432_v18 }
 0x16e   :  { %v134_v20 = vpop.xlane.xlu2 %133 }
 0x16f   :  { %v128_v12 = vpop.xlane.xlu0 %127  ;;  %v429_v31 = vperm.slane %v134_v20, %v422_v10 }
 0x170   :  { %v427_v21 = vperm.slane %v128_v12, %v422_v10 }
 0x172   :  { %v434_v33 = vsel %vm375_vm6, %v427_v21, %v433_v28 }
 0x177   :  { %v137_v23 = vpop.xlane.xlu0 %136 }
 0x178   :  { %v430_v34 = vperm.slane %v137_v23, %v422_v10 }
 0x185   :  { %v794_v24 = vpop.f32.mrf.mxu3 }
 0x186   :  { %v217_v29 = vpop.f32.mrf.mxu2  ;;  %v131_v30 = vpop.xlane.xlu1 %130  ;;  %v469_v35 = vrot.slane %v794_v24, 6  ;;  %v371_v54 = vrot.slane %v794_v24, 5  ;;  %v511_v55 = vrot.slane %v794_v24, 7  ;;  %v596_v56 = vrot.slane %v794_v24, 1 }
 0x187   :  { %v467_v32 = vrot.slane %v217_v29, 7  ;;  %v428_v36 = vperm.slane %v131_v30, %v422_v10  ;;  %v368_v42 = vrot.slane %v217_v29, 6  ;;  %v552_v43 = vrot.slane %v217_v29, 1 }
 0x188   :  { %v190_v37 = vpop.f32.mrf.mxu1  ;;  %v594_v50 = vrot.slane %v217_v29, 2 }
 0x189   :  { %v365_v38 = vrot.slane %v190_v37, 7  ;;  %v466_v39 = vsel %vm366_vm3, %v190_v37, %v465_v22  ;;  %v508_v40 = vrot.slane %v190_v37, 1  ;;  %v550_v41 = vrot.slane %v190_v37, 2 }
 0x18a   :  { %v435_v44 = vsel %vm378_vm7, %v428_v36, %v434_v33  ;;  %v592_v45 = vrot.slane %v190_v37, 3  ;;  %v468_v48 = vsel %vm369_vm4, %v467_v32, %v466_v39 }
 0x18b   :  { %v436_v46 = vsel %vm381_vm8, %v429_v31, %v435_v44  ;;  %v367_v47 = vsel %vm366_vm3, %v365_v38, %v163_v17  ;;  %v509_v49 = vsel %vm366_vm3, %v508_v40, %v507_v25  ;;  %v551_v52 = vsel %vm366_vm3, %v550_v41, %v549_v26 }
 0x18c   :  { %v370_v51 = vsel %vm369_vm4, %v368_v42, %v367_v47  ;;  %v593_v53 = vsel %vm366_vm3, %v592_v45, %v591_v27  ;;  %v437_v57 = vsel %vm384_vm9, %v430_v34, %v436_v46  ;;  %v470_v59 = vsel %vm372_vm5, %v469_v35, %v468_v48 }
 0x18d   :  { %v352_v58 = vpop.f32.mrf.mxu3  ;;  %v510_v60 = vsel %vm369_vm4, %v217_v29, %v509_v49  ;;  %v553_v61 = vsel %vm369_vm4, %v552_v43, %v551_v52  ;;  %661 = vmatmul.msk.f32.vlgmr.msra.gmra.mxu1 %vm386_vm10, %v437_v57  ;;  %v595_v63 = vsel %vm369_vm4, %v594_v50, %v593_v53  ;;  %v373_v3 = vsel %vm372_vm5, %v371_v54, %v370_v51  ;;  %v676_v54 = vld [vmem:[%s856_s3] ss:$0 sm:$0xff] }
 0x18e   :  { %v325_v62 = vpop.f32.mrf.mxu2  ;;  %v383_v0 = vrot.slane %v352_v58, 1  ;;  %v477_v1 = vrot.slane %v352_v58, 2  ;;  %v519_v2 = vrot.slane %v352_v58, 3  ;;  %v597_v12 = vsel %vm372_vm5, %v596_v56, %v595_v63 }
 0x18f   :  { %v380_v4 = vrot.slane %v325_v62, 2  ;;  %v475_v5 = vrot.slane %v325_v62, 3  ;;  %v517_v6 = vrot.slane %v325_v62, 4  ;;  %v601_v7 = vrot.slane %v325_v62, 6 }
 0x190   :  { %v271_v8 = vpop.f32.mrf.mxu0  ;;  %v603_v13 = vrot.slane %v352_v58, 5  ;;  %v512_v17 = vsel %vm372_vm5, %v511_v55, %v510_v60  ;;  %v554_v21 = vsel %vm372_vm5, %v794_v24, %v553_v61  ;;  %v559_v41 = vrot.slane %v325_v62, 5 }
 0x191   :  { %v374_v9 = vrot.slane %v271_v8, 4  ;;  %v471_v10 = vrot.slane %v271_v8, 5  ;;  %v513_v11 = vrot.slane %v271_v8, 6  ;;  %v555_v14 = vrot.slane %v271_v8, 7 }
 0x192   :  { %v598_v15 = vsel %vm375_vm6, %v271_v8, %v597_v12  ;;  %v298_v16 = vpop.f32.mrf.mxu1  ;;  %v561_v43 = vrot.slane %v352_v58, 4 }
 0x193   :  { %v377_v18 = vrot.slane %v298_v16, 3  ;;  %v473_v19 = vrot.slane %v298_v16, 4  ;;  %v515_v20 = vrot.slane %v298_v16, 5  ;;  %v599_v22 = vrot.slane %v298_v16, 7 }
 0x194   :  { %v376_v23 = vsel %vm375_vm6, %v374_v9, %v373_v3  ;;  %v472_v25 = vsel %vm375_vm6, %v471_v10, %v470_v59  ;;  %v514_v26 = vsel %vm375_vm6, %v513_v11, %v512_v17  ;;  %v557_v27 = vrot.slane %v298_v16, 6 }
 0x195   :  { %v379_v28 = vsel %vm378_vm7, %v377_v18, %v376_v23  ;;  %v474_v29 = vsel %vm378_vm7, %v473_v19, %v472_v25  ;;  %v516_v30 = vsel %vm378_vm7, %v515_v20, %v514_v26  ;;  %v600_v33 = vsel %vm378_vm7, %v599_v22, %v598_v15 }
 0x196   :  { %v382_v31 = vsel %vm381_vm8, %v380_v4, %v379_v28  ;;  %v476_v32 = vsel %vm381_vm8, %v475_v5, %v474_v29  ;;  %v518_v24 = vsel %vm381_vm8, %v517_v6, %v516_v30  ;;  %v602_v37 = vsel %vm381_vm8, %v601_v7, %v600_v33 }
 0x197   :  { %v385_v34 = vsel %vm384_vm9, %v383_v0, %v382_v31  ;;  %v478_v35 = vsel %vm384_vm9, %v477_v1, %v476_v32  ;;  %v520_v36 = vsel %vm384_vm9, %v519_v2, %v518_v24  ;;  %v604_v38 = vsel %vm384_vm9, %v603_v13, %v602_v37 }
 0x198   :  { %659 = vmatmul.msk.f32.vlgmr.msra.gmra.mxu0 %vm386_vm10, %v385_v34  ;;  %664 = vmatmul.msk.f32.vlgmr.msra.gmra.mxu2 %vm386_vm10, %v478_v35  ;;  %v556_v39 = vsel %vm375_vm6, %v555_v14, %v554_v21 }
 0x199   :  { %667 = vmatmul.msk.f32.vlgmr.msra.gmra.mxu3 %vm386_vm10, %v520_v36  ;;  %673 = vmatmul.msk.f32.vlgmr.msrb.gmra.mxu1 %vm386_vm10, %v604_v38  ;;  %v558_v40 = vsel %vm378_vm7, %v557_v27, %v556_v39 }
 0x19a   :  { %v560_v42 = vsel %vm381_vm8, %v559_v41, %v558_v40 }
 0x19b   :  { %v562_v44 = vsel %vm384_vm9, %v561_v43, %v560_v42 }
 0x1a0   :  { %670 = vmatmul.msk.f32.vlgmr.msrb.gmra.mxu0 %vm386_vm10, %v562_v44 }
 0x20a   :  { %v460_v46 = vpop.f32.mrf.mxu1 }
 0x215   :  { %v410_v45 = vpop.f32.mrf.mxu0 }
 0x216   :  { %v461_v47 = vadd.f32 %v460_v46, %v410_v45  ;;  %v627_v55 = vpop.f32.mrf.mxu1 }
 0x21b   :  { %v501_v48 = vpop.f32.mrf.mxu2 }
 0x21c   :  { %v504_v49 = vadd.f32 %v501_v48, %v461_v47  ;;  %v543_v50 = vpop.f32.mrf.mxu3 }
 0x21d   :  { %v585_v52 = vpop.f32.mrf.mxu0 }
 0x21e   :  { %v546_v51 = vadd.f32 %v543_v50, %v504_v49 }
 0x220   :  { %v588_v53 = vadd.f32 %v585_v52, %v546_v51 }
 0x222   :  { %v630_v56 = vadd.f32 %v627_v55, %v588_v53 }
 0x224   :  { %v635_v57 = vadd.f32 %v676_v54, %v630_v56 }
 0x226   :  { %637 = vst.msk [vmem:[%s857_s4] sm:$0xff] %vm636_vm11, %v635_v57 }

</bundles_post_ra>
